<compile_context>
chip_gen: v7x
topology: tpu7x:2x2x1
jax: 0.10.0
libtpu: 0.0.40
codegen_flags: <defaults>
</compile_context>

<pallas_src>
import math
from functools import lru_cache

import jax
import jax.numpy as jnp
from jax.experimental import pallas as pl
from jax.experimental.pallas import tpu as pltpu


_INV_SQRT2 = 1.0 / math.sqrt(2.0)


def _round_up(x, m):
    return (x + m - 1) // m * m


def _cdiv(a, b):
    return -(-a // b)


def _gelu_exact(h):
    # Exact erf-based GELU (torch.nn.GELU() default semantics), computed in f32.
    # TODO(synk): if a bundle dump ever shows the VALU erf polynomial binding
    # (very narrow MLPs), a tanh-approx GELU would move it to the EUP slot, but
    # that changes semantics, so it is intentionally not done here.
    return 0.5 * h * (1.0 + jax.lax.erf(h * jnp.float32(_INV_SQRT2)))


@lru_cache(maxsize=None)
def _chip_vmem_limit_bytes():
    """Per-chip default vmem_limit_bytes, leaving headroom below physical VMEM."""
    cap = None
    try:
        cap = int(pltpu.get_tpu_info().vmem_capacity_bytes)
    except Exception:
        cap = None
    if cap is None or cap <= 0:
        try:
            kind = jax.devices()[0].device_kind.lower()
        except Exception:
            kind = ""
        cap = (64 << 20) if "v7" in kind else (128 << 20)
    if cap <= (64 << 20):
        # v7x: never request the entire 64 MiB/TC -- leave room for compiler
        # internal scratch and the pipeline double buffers.
        limit = cap - (12 << 20)
    else:
        # v5e / v6e: 128 MiB physical but a low scoped default -> raise it.
        limit = min(cap - (24 << 20), 104 << 20)
    return max(limit, 32 << 20)


# ----------------------------------------------------------------------------
# Kernels
# ----------------------------------------------------------------------------

def _mlp_kernel_resident(x_ref, w1_ref, b1_ref, w2_ref, b2_ref, o_ref):
    """Whole hidden dim resident (n_h == 1): fused fc1 -> GELU -> fc2."""
    h = jnp.dot(x_ref[...], w1_ref[...], preferred_element_type=jnp.float32)
    h = _gelu_exact(h + b1_ref[...])
    out = jnp.dot(h.astype(w2_ref.dtype), w2_ref[...],
                  preferred_element_type=jnp.float32)
    o_ref[...] = (out + b2_ref[...]).astype(o_ref.dtype)


def _mlp_kernel_chunked_f32out(x_ref, w1_ref, b1_ref, w2_ref, b2_ref, o_ref):
    """Hidden dim chunked; the f32 output block itself is the accumulator."""
    k = pl.program_id(1)
    h = jnp.dot(x_ref[...], w1_ref[...], preferred_element_type=jnp.float32)
    h = _gelu_exact(h + b1_ref[pl.ds(k, 1), :])        # b1 resident, sliced per chunk
    part = jnp.dot(h.astype(w2_ref.dtype), w2_ref[...],
                   preferred_element_type=jnp.float32)

    @pl.when(k == 0)
    def _():
        o_ref[...] = part + b2_ref[...]

    @pl.when(k != 0)
    def _():
        o_ref[...] = o_ref[...] + part


def _mlp_kernel_chunked_acc(x_ref, w1_ref, b1_ref, w2_ref, b2_ref, o_ref, acc_ref):
    """Hidden dim chunked; f32 scratch accumulator for non-f32 outputs."""
    k = pl.program_id(1)
    h = jnp.dot(x_ref[...], w1_ref[...], preferred_element_type=jnp.float32)
    h = _gelu_exact(h + b1_ref[pl.ds(k, 1), :])
    part = jnp.dot(h.astype(w2_ref.dtype), w2_ref[...],
                   preferred_element_type=jnp.float32)

    @pl.when(k == 0)
    def _():
        acc_ref[...] = part

    @pl.when(k != 0)
    def _():
        acc_ref[...] += part

    @pl.when(k == pl.num_programs(1) - 1)
    def _():
        o_ref[...] = (acc_ref[...] + b2_ref[...]).astype(o_ref.dtype)


# ----------------------------------------------------------------------------
# One-time parameter preparation (outside the hot path)
# ----------------------------------------------------------------------------

def prepare_mlp_params(w1, b1, w2, b2, *, hidden_block=None, param_dtype=None,
                       vmem_limit_bytes=None):
    """Prepare PyTorch nn.Linear weights (w1: (H, Cin), w2: (Cout, H)) once.

    Transposes to (Cin, H) / (H, Cout), zero-pads Cin/Cout/H to multiples of
    128 (lane-dense MXU blocks, unmasked stores) and decides the hidden
    chunking by VMEM budget: H stays un-chunked whenever the double-buffered
    weights fit in ~1/3 of the vmem limit; otherwise H is split into th-wide
    chunks (multiple of 128, sized to the budget) and b1 is reshaped to
    (n_h, th) so it can live as a single resident block.  All zero padding is
    mathematically inert (GELU(0)=0 against zero w2 rows; padded Cout columns
    are sliced off by the wrapper).
    """
    hidden, cin = w1.shape
    cout = w2.shape[0]

    if param_dtype is not None:
        w1 = w1.astype(param_dtype)
        b1 = b1.astype(param_dtype)
        w2 = w2.astype(param_dtype)
        b2 = b2.astype(param_dtype)

    wsz = jnp.dtype(w1.dtype).itemsize
    cin_p = _round_up(cin, 128)
    cout_p = _round_up(cout, 128)
    h128 = _round_up(hidden, 128)

    budget = int(vmem_limit_bytes or _chip_vmem_limit_bytes())

    if hidden_block is None:
        full_w = 2 * (cin_p * h128 + h128 * cout_p) * wsz   # double-buffered
        if full_w <= budget // 3:
            hidden_block = h128                              # fully resident
        else:
            per_col = 2 * (cin_p + cout_p) * wsz             # bytes / hidden column
            th_max = max((budget // 3) // max(per_col, 1), 128)
            th_max = min(th_max, 2048, h128)
            n_chunks = _cdiv(h128, th_max)
            hidden_block = _round_up(_cdiv(h128, n_chunks), 128)
    else:
        hidden_block = _round_up(min(hidden_block, h128), 128)

    h_pad = _round_up(h128, hidden_block)
    n_h = h_pad // hidden_block

    w1t = jnp.transpose(w1)                                   # (Cin, H)
    w2t = jnp.transpose(w2)                                   # (H, Cout)
    w1t = jnp.pad(w1t, ((0, cin_p - cin), (0, h_pad - hidden)))
    w2t = jnp.pad(w2t, ((0, h_pad - hidden), (0, cout_p - cout)))
    b1r = jnp.pad(b1.reshape(1, hidden), ((0, 0), (0, h_pad - hidden)))
    b1r = b1r.reshape(n_h, hidden_block)                      # row k = chunk-k bias
    b2r = jnp.pad(b2.reshape(1, cout), ((0, 0), (0, cout_p - cout)))

    return dict(w1t=w1t, b1=b1r, w2t=w2t, b2=b2r,
                hidden_block=hidden_block, n_h=n_h, h_pad=h_pad,
                in_features=cin, out_features=cout,
                cin_pad=cin_p, cout_pad=cout_p,
                vmem_limit_bytes=budget)


# ----------------------------------------------------------------------------
# Wrapper
# ----------------------------------------------------------------------------

def _step_vmem_bytes(tm, cin_p, cout_p, th, n_h, xsz, wsz, osz, use_acc):
    """Rough per-grid-step VMEM footprint (double-buffered pipeline blocks)."""
    b = 2 * tm * cin_p * xsz                       # x tile
    b += 2 * tm * cout_p * osz                     # out tile
    b += 2 * (cin_p * th + th * cout_p) * wsz      # w1 / w2 blocks
    b += 2 * (n_h * th + cout_p) * wsz             # b1 (full) + b2
    b += tm * th * 4                               # f32 fc1 / GELU intermediate
    b += tm * cout_p * 4                           # f32 fc2 result
    if use_acc:
        b += tm * cout_p * 4                       # accumulator scratch
    return b


def mlp_pallas(x, params, *, tm=None, vmem_limit_bytes=None):
    """Apply Mlp (fc1 -> GELU -> fc2; Dropout(p=0) is identity) to x[..., Cin]."""
    w1t, b1r, w2t, b2r = params["w1t"], params["b1"], params["w2t"], params["b2"]
    th = params["hidden_block"]
    n_h = params["n_h"]
    h_pad = params["h_pad"]
    cin, cout = params["in_features"], params["out_features"]
    cin_p, cout_p = params["cin_pad"], params["cout_pad"]
    assert x.shape[-1] == cin

    vmem_limit = int(vmem_limit_bytes or params.get("vmem_limit_bytes")
                     or _chip_vmem_limit_bytes())

    lead = x.shape[:-1]
    M = math.prod(lead) if lead else 1
    x2d = x.reshape(M, cin)

    out_dtype = x.dtype
    xsz = jnp.dtype(x.dtype).itemsize
    wsz = jnp.dtype(w1t.dtype).itemsize
    osz = jnp.dtype(out_dtype).itemsize
    use_acc = (n_h > 1) and (out_dtype != jnp.float32)

    # Row tiling: tm ~ 512 reaches the compute roofline on v5e/v6e/v7x with
    # bf16 weights once H is resident.  Keep >= 2 row tiles when M is large
    # enough so the "parallel" M axis can shard across v7x's 2 TensorCores;
    # shrink tm if the per-step VMEM estimate would blow the budget.
    sub = max(8, 32 // xsz)                       # sublane multiple for x dtype
    tm_req = 512 if tm is None else max(int(tm), sub)
    n_m = max(1, _cdiv(M, tm_req))
    if n_m == 1 and M >= 512:
        n_m = 2
    tm_eff = _round_up(_cdiv(M, n_m), sub)
    while (tm_eff > sub and
           _step_vmem_bytes(tm_eff, cin_p, cout_p, th, n_h, xsz, wsz, osz,
                            use_acc) > (vmem_limit * 9) // 10):
        n_m *= 2
        tm_eff = _round_up(_cdiv(M, n_m), sub)
    m_pad = n_m * tm_eff

    if m_pad != M or cin_p != cin:
        x2d = jnp.pad(x2d, ((0, m_pad - M), (0, cin_p - cin)))

    weight_passes = 1 if n_h == 1 else n_m        # chunked weights re-stream / tile
    cost = pl.CostEstimate(
        flops=2 * m_pad * h_pad * (cin_p + cout_p),
        transcendentals=m_pad * h_pad,
        bytes_accessed=int(m_pad * cin_p * xsz + m_pad * cout_p * osz
                           + weight_passes * (w1t.nbytes + w2t.nbytes)
                           + b1r.nbytes + b2r.nbytes),
    )

    if n_h == 1:
        grid = (n_m,)
        in_specs = [
            pl.BlockSpec((tm_eff, cin_p), lambda i: (i, 0)),
            pl.BlockSpec((cin_p, h_pad), lambda i: (0, 0)),   # resident, DMA'd once
            pl.BlockSpec((1, h_pad), lambda i: (0, 0)),
            pl.BlockSpec((h_pad, cout_p), lambda i: (0, 0)),  # resident, DMA'd once
            pl.BlockSpec((1, cout_p), lambda i: (0, 0)),
        ]
        out_spec = pl.BlockSpec((tm_eff, cout_p), lambda i: (i, 0))
        kernel = _mlp_kernel_resident
        scratch = []
        sems = ("parallel",)
    else:
        grid = (n_m, n_h)                                     # reduction axis last
        in_specs = [
            pl.BlockSpec((tm_eff, cin_p), lambda i, k: (i, 0)),
            pl.BlockSpec((cin_p, th), lambda i, k: (0, k)),
            pl.BlockSpec((n_h, th), lambda i, k: (0, 0)),     # full b1, sliced in-kernel
            pl.BlockSpec((th, cout_p), lambda i, k: (k, 0)),
            pl.BlockSpec((1, cout_p), lambda i, k: (0, 0)),
        ]
        out_spec = pl.BlockSpec((tm_eff, cout_p), lambda i, k: (i, 0))
        if use_acc:
            kernel = _mlp_kernel_chunked_acc
            scratch = [pltpu.VMEM((tm_eff, cout_p), jnp.float32)]
        else:
            kernel = _mlp_kernel_chunked_f32out               # accumulate in o_ref
            scratch = []
        sems = ("parallel", "arbitrary")

    out2d = pl.pallas_call(
        kernel,
        out_shape=jax.ShapeDtypeStruct((m_pad, cout_p), out_dtype),
        grid_spec=pltpu.PrefetchScalarGridSpec(
            num_scalar_prefetch=0,
            grid=grid,
            in_specs=in_specs,
            out_specs=out_spec,
            scratch_shapes=scratch,
        ),
        compiler_params=pltpu.CompilerParams(
            dimension_semantics=sems,
            vmem_limit_bytes=vmem_limit),
        cost_estimate=cost,
    )(x2d, w1t, b1r, w2t, b2r)

    if m_pad != M or cout_p != cout:
        out2d = out2d[:M, :cout]
    return out2d.reshape(*lead, cout)


# ----------------------------------------------------------------------------
# Reference / init / tests
# ----------------------------------------------------------------------------

def init_mlp_params(key, in_features, hidden_features=None, out_features=None,
                    dtype=jnp.float32):
    """Synthetic init mirroring nn.Linear shapes (Kaiming-uniform-ish)."""
    out_features = out_features or in_features
    hidden_features = hidden_features or in_features
    k1, k2, k3, k4 = jax.random.split(key, 4)
    bound1 = 1.0 / math.sqrt(in_features)
    bound2 = 1.0 / math.sqrt(hidden_features)
    w1 = jax.random.uniform(k1, (hidden_features, in_features),
                            minval=-bound1, maxval=bound1, dtype=dtype)
    b1 = jax.random.uniform(k2, (hidden_features,),
                            minval=-bound1, maxval=bound1, dtype=dtype)
    w2 = jax.random.uniform(k3, (out_features, hidden_features),
                            minval=-bound2, maxval=bound2, dtype=dtype)
    b2 = jax.random.uniform(k4, (out_features,),
                            minval=-bound2, maxval=bound2, dtype=dtype)
    return w1, b1, w2, b2


def mlp_reference(x, w1, b1, w2, b2):
    h = x @ w1.T + b1
    h = 0.5 * h * (1.0 + jax.lax.erf(h * jnp.float32(_INV_SQRT2)))
    return h @ w2.T + b2


if __name__ == "__main__":
    key = jax.random.PRNGKey(0)
    kx, kp, kx2, kp2, kx3, kp3 = jax.random.split(key, 6)

    # --- Test 1: small dims (Cin/Cout < 128 -> lane padding), H resident ----
    batch, seq, in_features, hidden = 2, 8, 32, 64
    x = jax.random.normal(kx, (batch, seq, in_features), dtype=jnp.float32)
    w1, b1, w2, b2 = init_mlp_params(kp, in_features, hidden_features=hidden)
    params = prepare_mlp_params(w1, b1, w2, b2)                # one-time prep
    out = jax.block_until_ready(mlp_pallas(x, params))
    ref = mlp_reference(x, w1, b1, w2, b2)
    assert out.shape == (batch, seq, in_features)
    assert jnp.allclose(out, ref, atol=1e-5, rtol=1e-5), "mismatch vs reference (test 1)"

    # --- Test 2: row-tile padding + chunked H with in-place f32 output acc --
    batch2, seq2, in2, hidden2 = 2, 135, 32, 256               # M = 270
    x2 = jax.random.normal(kx2, (batch2, seq2, in2), dtype=jnp.float32)
    w1b, b1b, w2b, b2b = init_mlp_params(kp2, in2, hidden_features=hidden2)
    params2 = prepare_mlp_params(w1b, b1b, w2b, b2b, hidden_block=128)  # force 2 chunks
    out2 = jax.block_until_ready(mlp_pallas(x2, params2, tm=128))       # 3 row tiles
    ref2 = mlp_reference(x2, w1b, b1b, w2b, b2b)
    assert out2.shape == (batch2, seq2, in2)
    assert jnp.allclose(out2, ref2, atol=1e-5, rtol=1e-5), "mismatch vs reference (test 2)"

    # --- Test 3: bf16 weights/activations (f32 accumulation), M >= 512 ------
    batch3, seq3, in3, hidden3 = 4, 150, 128, 512              # M = 600 -> 2 row tiles
    x3 = jax.random.normal(kx3, (batch3, seq3, in3), dtype=jnp.float32).astype(jnp.bfloat16)
    w1c, b1c, w2c, b2c = init_mlp_params(kp3, in3, hidden_features=hidden3)
    params3 = prepare_mlp_params(w1c, b1c, w2c, b2c, param_dtype=jnp.bfloat16)
    out3 = jax.block_until_ready(mlp_pallas(x3, params3))
    ref3 = mlp_reference(x3.astype(jnp.float32),
                         w1c.astype(jnp.bfloat16).astype(jnp.float32),
                         b1c.astype(jnp.bfloat16).astype(jnp.float32),
                         w2c.astype(jnp.bfloat16).astype(jnp.float32),
                         b2c.astype(jnp.bfloat16).astype(jnp.float32))
    assert out3.shape == (batch3, seq3, in3)
    max_err = float(jnp.max(jnp.abs(out3.astype(jnp.float32) - ref3)))
    assert max_err < 7e-2, f"mismatch vs reference (test 3), max err {max_err}"

    print("KERNEL_OK")
</pallas_src>

<mosaic_0001>
module attributes {stable_mosaic.version = 11 : i64} {
  func.func @_mlp_kernel_resident(%arg0: i32, %arg1: memref<16x128xf32, #tpu.memory_space<vmem>>, %arg2: memref<128x128xf32, #tpu.memory_space<vmem>>, %arg3: memref<1x128xf32, #tpu.memory_space<vmem>>, %arg4: memref<128x128xf32, #tpu.memory_space<vmem>>, %arg5: memref<1x128xf32, #tpu.memory_space<vmem>>, %arg6: memref<16x128xf32, #tpu.memory_space<vmem>>) attributes {dimension_semantics = [#tpu.dimension_semantics<parallel>], iteration_bounds = array<i64: 1>, scalar_prefetch = 0 : i64, scratch_operands = 0 : i64, tpu.core_type = #tpu.core_type<tc>, window_params = [{transform_indices = @transform_0, window_bounds = array<i64: 16, 128>}, {pipeline_mode = #tpu.pipeline_mode<synchronous>, transform_indices = @transform_1, window_bounds = array<i64: 128, 128>}, {pipeline_mode = #tpu.pipeline_mode<synchronous>, transform_indices = @transform_2, window_bounds = array<i64: 1, 128>}, {pipeline_mode = #tpu.pipeline_mode<synchronous>, transform_indices = @transform_3, window_bounds = array<i64: 128, 128>}, {pipeline_mode = #tpu.pipeline_mode<synchronous>, transform_indices = @transform_4, window_bounds = array<i64: 1, 128>}, {transform_indices = @transform_5, window_bounds = array<i64: 16, 128>}]} {
    %c0 = arith.constant 0 : index
    %c0_0 = arith.constant 0 : index
    %0 = vector.load %arg1[%c0, %c0_0] : memref<16x128xf32, #tpu.memory_space<vmem>>, vector<16x128xf32>
    %c0_1 = arith.constant 0 : index
    %c0_2 = arith.constant 0 : index
    %1 = vector.load %arg2[%c0_1, %c0_2] : memref<128x128xf32, #tpu.memory_space<vmem>>, vector<128x128xf32>
    %cst = arith.constant dense<0.000000e+00> : vector<16x128xf32>
    %2 = tpu.matmul %0, %1, %cst {dimension_numbers = #tpu.dot_dimension_numbers<[1], [0], [0], [1], [0, 0, 1, 1], [], []>} : vector<16x128xf32>, vector<128x128xf32>, vector<16x128xf32> -> vector<16x128xf32>
    %c0_3 = arith.constant 0 : index
    %c0_4 = arith.constant 0 : index
    %3 = vector.load %arg3[%c0_3, %c0_4] : memref<1x128xf32, #tpu.memory_space<vmem>>, vector<1x128xf32>
    %4 = vector.broadcast %3 : vector<1x128xf32> to vector<16x128xf32>
    %5 = arith.addf %2, %4 : vector<16x128xf32>
    %cst_5 = arith.constant 5.000000e-01 : f32
    %6 = vector.broadcast %cst_5 : f32 to vector<16x128xf32>
    %7 = arith.mulf %6, %5 : vector<16x128xf32>
    %cst_6 = arith.constant 0.707106769 : f32
    %8 = vector.broadcast %cst_6 : f32 to vector<16x128xf32>
    %9 = arith.mulf %5, %8 : vector<16x128xf32>
    %10 = math.erf %9 : vector<16x128xf32>
    %cst_7 = arith.constant 1.000000e+00 : f32
    %11 = vector.broadcast %cst_7 : f32 to vector<16x128xf32>
    %12 = arith.addf %11, %10 : vector<16x128xf32>
    %13 = arith.mulf %7, %12 : vector<16x128xf32>
    %c0_8 = arith.constant 0 : index
    %c0_9 = arith.constant 0 : index
    %14 = vector.load %arg4[%c0_8, %c0_9] : memref<128x128xf32, #tpu.memory_space<vmem>>, vector<128x128xf32>
    %cst_10 = arith.constant dense<0.000000e+00> : vector<16x128xf32>
    %15 = tpu.matmul %13, %14, %cst_10 {dimension_numbers = #tpu.dot_dimension_numbers<[1], [0], [0], [1], [0, 0, 1, 1], [], []>} : vector<16x128xf32>, vector<128x128xf32>, vector<16x128xf32> -> vector<16x128xf32>
    %c0_11 = arith.constant 0 : index
    %c0_12 = arith.constant 0 : index
    %16 = vector.load %arg5[%c0_11, %c0_12] : memref<1x128xf32, #tpu.memory_space<vmem>>, vector<1x128xf32>
    %17 = vector.broadcast %16 : vector<1x128xf32> to vector<16x128xf32>
    %18 = arith.addf %15, %17 : vector<16x128xf32>
    %c0_13 = arith.constant 0 : index
    %c0_14 = arith.constant 0 : index
    %19 = vector.load %arg6[%c0_13, %c0_14] : memref<16x128xf32, #tpu.memory_space<vmem>>, vector<16x128xf32>
    tpu.vector_store %arg6[%c0_13, %c0_14], %18 {strides = array<i32>} : memref<16x128xf32, #tpu.memory_space<vmem>>, vector<16x128xf32>,
    return
  }
  func.func @transform_0(%arg0: i32) -> (i32, i32) {
    %c0_i32 = arith.constant 0 : i32
    %c0_i32_0 = arith.constant 0 : i32
    return %arg0, %c0_i32 : i32, i32
  }
  func.func @transform_1(%arg0: i32) -> (i32, i32) {
    %c0_i32 = arith.constant 0 : i32
    %c0_i32_0 = arith.constant 0 : i32
    %c0_i32_1 = arith.constant 0 : i32
    return %c0_i32, %c0_i32_0 : i32, i32
  }
  func.func @transform_2(%arg0: i32) -> (i32, i32) {
    %c0_i32 = arith.constant 0 : i32
    %c0_i32_0 = arith.constant 0 : i32
    %c0_i32_1 = arith.constant 0 : i32
    return %c0_i32, %c0_i32_0 : i32, i32
  }
  func.func @transform_3(%arg0: i32) -> (i32, i32) {
    %c0_i32 = arith.constant 0 : i32
    %c0_i32_0 = arith.constant 0 : i32
    %c0_i32_1 = arith.constant 0 : i32
    return %c0_i32, %c0_i32_0 : i32, i32
  }
  func.func @transform_4(%arg0: i32) -> (i32, i32) {
    %c0_i32 = arith.constant 0 : i32
    %c0_i32_0 = arith.constant 0 : i32
    %c0_i32_1 = arith.constant 0 : i32
    return %c0_i32, %c0_i32_0 : i32, i32
  }
  func.func @transform_5(%arg0: i32) -> (i32, i32) {
    %c0_i32 = arith.constant 0 : i32
    %c0_i32_0 = arith.constant 0 : i32
    return %arg0, %c0_i32 : i32, i32
  }
}

</mosaic_0001>

<bundles_post_ra>
// kernel: tpu_custom_call.1
= control target key start
LH: loop header
LB: loop body
LE: loop exit
PB: predicated region body
PF: predicated region fallthrough
CT: control target
= control target key end

     0   :  { %10 = vsyncpa [#allocation3], 0  ;;  %s767_s0 = inlined_call_operand.hbm [shape: f32[16,128], index: 0, kind: input, shape index: {}]   ;;  %s768_s1 = inlined_call_operand.hbm [shape: f32[128,128], index: 1, kind: input, shape index: {}]   ;;  %s769_s2 = inlined_call_operand.hbm [shape: f32[1,128], index: 2, kind: input, shape index: {}]   ;;  %s770_s3 = inlined_call_operand.hbm [shape: f32[128,128], index: 3, kind: input, shape index: {}]   ;;  %s771_s4 = inlined_call_operand.hbm [shape: f32[1,128], index: 4, kind: input, shape index: {}]   ;;  %s772_s5 = inlined_call_operand.hbm [shape: f32[16,128], index: 5, kind: output, shape index: {}]  }
   0x1   :  { %11 = vsyncpa [#allocation6], 0 }
   0x2   :  { %12 = vsyncpa [#allocation9], 0 }
   0x3   :  { %13 = vsyncpa [#allocation4], 0  ;;  %s638_s18 = smov [#allocation5]   ;;  %s639_s20 = smov [#allocation8]  }
   0x4   :  { %s31_s19 = sshll.u32 %s638_s18, 4  ;;  %s53_s21 = sshll.u32 %s639_s20, 4  ;;  %s32_s19 = int_to_ptr.vmem [resolvable:$true] %s31_s19  ;;  %s676_s21 = int_to_ptr.vmem [resolvable:$true] %s53_s21 }
   0x5   :  { %s498_s24 = scalar_lea.hbm %s768_s1, 2048 }
   0x6   :  { %p499_p0 = scmp.ne.s32.totalorder %s768_s1, %s498_s24  ;;  %p502_p1 = scmp.lt.u32.totalorder %s498_s24, %s768_s1 }
   0x8   :  { %p504_p2 = pnand %p502_p1, %p499_p0 }
   0xa   :  { %507 = shalt.err (!%p504_p2)
}
   0xb   :  { %s508_s29 = scalar_lea.vmem %s32_s19, 2048  ;;  %p513_p4 = scmp.lt.s32.totalorder %s32_s19, %s32_s19 }
   0xc   :  { %p509_p3 = scmp.ne.s32.totalorder %s32_s19, %s508_s29  ;;  %p514_p5 = scmp.lt.s32.totalorder %s508_s29, %s508_s29 }
   0xe   :  { %p515_p6 = por %p514_p5, %p513_p4 }
  0x10   :  { %p516_p7 = pnand %p515_p6, %p509_p3 }
  0x12   :  { %519 = shalt.err (!%p516_p7)
}
  0x13   :  { %s640_s30 = smov 128   ;;  %s641_s6 = smov 8  }
  0x14   :  { %37 = dma.hbm_to_vmem [thread:$0]  %s768_s1, 2048, %s32_s19, [#allocation6], %s640_s30, %s640_s30, %s641_s6  }
  0x15   :  { %s520_s11 = scalar_lea.hbm %s770_s3, 2048 }
  0x16   :  { %p521_p8 = scmp.ne.s32.totalorder %s770_s3, %s520_s11  ;;  %p524_p9 = scmp.lt.u32.totalorder %s520_s11, %s770_s3 }
  0x18   :  { %p526_p10 = pnand %p524_p9, %p521_p8 }
  0x1a   :  { %529 = shalt.err (!%p526_p10)
}
  0x1b   :  { %s530_s16 = scalar_lea.vmem %s676_s21, 2048  ;;  %p535_p12 = scmp.lt.s32.totalorder %s676_s21, %s676_s21 }
  0x1c   :  { %p531_p11 = scmp.ne.s32.totalorder %s676_s21, %s530_s16  ;;  %p536_p13 = scmp.lt.s32.totalorder %s530_s16, %s530_s16 }
  0x1e   :  { %p537_p0 = por %p536_p13, %p535_p12 }
  0x20   :  { %p538_p1 = pnand %p537_p0, %p531_p11 }
  0x22   :  { %541 = shalt.err (!%p538_p1)
}
  0x23   :  { %59 = dma.hbm_to_vmem [thread:$0]  %s770_s3, 2048, %s676_s21, [#allocation9], %s640_s30, %s640_s30, %s641_s6  }
  0x24   :  { %s642_s18 = smov [#allocation2]   ;;  %s643_s20 = smov [#allocation7]  }
  0x25   :  { %s19_s19 = sshll.u32 %s642_s18, 4  ;;  %s44_s22 = sshll.u32 %s643_s20, 4  ;;  %s20_s19 = int_to_ptr.vmem [resolvable:$true] %s19_s19  ;;  %s45_s22 = int_to_ptr.vmem [resolvable:$true] %s44_s22 }
  0x26   :  { %s542_s25 = scalar_lea.hbm %s767_s0, 256 }
  0x27   :  { %p543_p2 = scmp.ne.s32.totalorder %s767_s0, %s542_s25  ;;  %p546_p3 = scmp.lt.u32.totalorder %s542_s25, %s767_s0 }
  0x29   :  { %p548_p4 = pnand %p546_p3, %p543_p2 }
  0x2b   :  { %551 = shalt.err (!%p548_p4)
}
  0x2c   :  { %s552_s3 = scalar_lea.vmem %s20_s19, 256  ;;  %p557_p6 = scmp.lt.s32.totalorder %s20_s19, %s20_s19 }
  0x2d   :  { %p553_p5 = scmp.ne.s32.totalorder %s20_s19, %s552_s3  ;;  %p558_p7 = scmp.lt.s32.totalorder %s552_s3, %s552_s3 }
  0x2f   :  { %p559_p8 = por %p558_p7, %p557_p6 }
  0x31   :  { %p560_p9 = pnand %p559_p8, %p553_p5 }
  0x33   :  { %563 = shalt.err (!%p560_p9)
}
  0x34   :  { %25 = dma.hbm_to_vmem [thread:$0]  %s767_s0, 256, %s20_s19, [#allocation3], %s640_s30, %s640_s30, %s641_s6  }
  0x35   :  { %s564_s10 = scalar_lea.hbm %s769_s2, 16 }
  0x36   :  { %p565_p10 = scmp.ne.s32.totalorder %s769_s2, %s564_s10  ;;  %p568_p11 = scmp.lt.u32.totalorder %s564_s10, %s769_s2 }
  0x38   :  { %p570_p12 = pnand %p568_p11, %p565_p10 }
  0x3a   :  { %573 = shalt.err (!%p570_p12)
}
  0x3b   :  { %s574_s15 = scalar_lea.vmem %s45_s22, 16  ;;  %s578_s16 = scalar_lea.vmem %s45_s22, 32 }
  0x3c   :  { %p575_p13 = scmp.ne.s32.totalorder %s45_s22, %s574_s15  ;;  %p579_p0 = scmp.lt.s32.totalorder %s45_s22, %s45_s22 }
  0x3d   :  { %p580_p1 = scmp.lt.s32.totalorder %s578_s16, %s574_s15 }
  0x3f   :  { %p581_p2 = por %p580_p1, %p579_p0 }
  0x41   :  { %p582_p3 = pnand %p581_p2, %p575_p13 }
  0x43   :  { %585 = shalt.err (!%p582_p3)
}
  0x44   :  { %47 = dma.hbm_to_vmem [thread:$0]  %s769_s2, 16, %s45_s22, [#allocation6]  }
  0x45   :  { %s644_s17 = smov [#allocation10]   ;;  %s586_s23 = scalar_lea.hbm %s771_s4, 16 }
  0x46   :  { %s66_s18 = sshll.u32 %s644_s17, 4  ;;  %p587_p4 = scmp.ne.s32.totalorder %s771_s4, %s586_s23  ;;  %s67_s18 = int_to_ptr.vmem [resolvable:$true] %s66_s18 }
  0x47   :  { %p590_p5 = scmp.lt.u32.totalorder %s586_s23, %s771_s4 }
  0x49   :  { %p592_p6 = pnand %p590_p5, %p587_p4 }
  0x4b   :  { %595 = shalt.err (!%p592_p6)
}
  0x4c   :  { %s596_s28 = scalar_lea.vmem %s67_s18, 16  ;;  %s600_s2 = scalar_lea.vmem %s67_s18, 32 }
  0x4d   :  { %p597_p7 = scmp.ne.s32.totalorder %s67_s18, %s596_s28  ;;  %p601_p8 = scmp.lt.s32.totalorder %s67_s18, %s67_s18 }
  0x4e   :  { %p602_p9 = scmp.lt.s32.totalorder %s600_s2, %s596_s28 }
  0x50   :  { %p603_p10 = por %p602_p9, %p601_p8 }
  0x52   :  { %p604_p11 = pnand %p603_p10, %p597_p7 }
  0x54   :  { %607 = shalt.err (!%p604_p11)
}
  0x55   :  { %69 = dma.hbm_to_vmem [thread:$0]  %s771_s4, 16, %s67_s18, [#allocation9]  }
  0x56   :  { %630 = dma.done.wait [#allocation3], 256  }
  0x57   :  { %631 = vsyncadd [#allocation3], 4294967040 }
  0x58   :  { %632 = dma.done.wait [#allocation6], 2064  }
  0x59   :  { %633 = vsyncadd [#allocation6], 4294965232 }
  0x5a   :  { %634 = dma.done.wait [#allocation9], 2064  }
  0x5b   :  { %635 = vsyncadd [#allocation9], 4294965232  ;;  %v87_v0 = vld [vmem:[#allocation5] sm:$0xff]  ;;  %v88_v1 = vld [vmem:[#allocation5 + $0x8] sm:$0xff]  ;;  %s645_s4 = smov [#allocation11]  }
  0x5c   :  { %v89_v2 = vld [vmem:[#allocation5 + $0x10] sm:$0xff]  ;;  %v422_v3 = vpack.c.bf16 %v88_v1, %v87_v0  ;;  %v90_v4 = vld [vmem:[#allocation5 + $0x18] sm:$0xff]  ;;  %v91_v6 = vld [vmem:[#allocation5 + $0x20] sm:$0xff]  ;;  %s300_s3 = sshll.u32 %s645_s4, 4  ;;  %s301_s3 = int_to_ptr.vmem [resolvable:$true] %s300_s3 }
  0x5d   :  { %v426_v5 = vpack.c.bf16 %v90_v4, %v89_v2  ;;  %v92_v7 = vld [vmem:[#allocation5 + $0x28] sm:$0xff]  ;;  %v93_v9 = vld [vmem:[#allocation5 + $0x30] sm:$0xff]  ;;  %v94_v10 = vld [vmem:[#allocation5 + $0x38] sm:$0xff]  ;;  %s608_s21 = scalar_lea.vmem %s301_s3, 256  ;;  %p613_p13 = scmp.lt.s32.totalorder %s301_s3, %s301_s3 }
  0x5e   :  { %423 = vmatprep.subr.bf16.mxu0 %v422_v3  ;;  %v430_v8 = vpack.c.bf16 %v92_v7, %v91_v6  ;;  %v85_v11 = vld [vmem:[#allocation2] sm:$0xff]  ;;  %v195_v12 = vld [vmem:[#allocation8] sm:$0xff]  ;;  %v198_v16 = vld [vmem:[#allocation8 + $0x18] sm:$0xff]  ;;  %v434_v20 = vpack.c.bf16 %v94_v10, %v93_v9  ;;  %p609_p12 = scmp.ne.s32.totalorder %s301_s3, %s608_s21  ;;  %p614_p0 = scmp.lt.s32.totalorder %s608_s21, %s608_s21 }
  0x5f   :  { %425 = vmatpush3.bf16.msra.mxu0 %v422_v3  ;;  %384 = vmatprep.mubr.f32.mxu0 %v85_v11  ;;  %v196_v13 = vld [vmem:[#allocation8 + $0x8] sm:$0xff]  ;;  %v197_v14 = vld [vmem:[#allocation8 + $0x10] sm:$0xff]  ;;  %v199_v18 = vld [vmem:[#allocation8 + $0x20] sm:$0xff] }
  0x60   :  { %427 = vmatprep.subr.bf16.mxu0 %v426_v5  ;;  %v454_v15 = vpack.c.bf16 %v196_v13, %v195_v12  ;;  %v458_v17 = vpack.c.bf16 %v198_v16, %v197_v14  ;;  %v200_v19 = vld [vmem:[#allocation8 + $0x28] sm:$0xff]  ;;  %v95_v21 = vld [vmem:[#allocation5 + $0x40] sm:$0xff]  ;;  %v98_v26 = vld [vmem:[#allocation5 + $0x58] sm:$0xff]  ;;  %p615_p1 = por %p614_p0, %p613_p13 }
  0x61   :  { %v96_v22 = vld [vmem:[#allocation5 + $0x48] sm:$0xff]  ;;  %v462_v23 = vpack.c.bf16 %v200_v19, %v199_v18  ;;  %v97_v25 = vld [vmem:[#allocation5 + $0x50] sm:$0xff]  ;;  %v99_v28 = vld [vmem:[#allocation5 + $0x60] sm:$0xff] }
  0x62   :  { %455 = vmatprep.subr.bf16.mxu1 %v454_v15  ;;  %v438_v24 = vpack.c.bf16 %v96_v22, %v95_v21  ;;  %v442_v27 = vpack.c.bf16 %v98_v26, %v97_v25  ;;  %v100_v29 = vld [vmem:[#allocation5 + $0x68] sm:$0xff]  ;;  %v101_v31 = vld [vmem:[#allocation5 + $0x70] sm:$0xff]  ;;  %v102_v32 = vld [vmem:[#allocation5 + $0x78] sm:$0xff]  ;;  %p616_p2 = pnand %p615_p1, %p609_p12 }
  0x63   :  { %429 = vmatpush3.bf16.msra.mxu0 %v426_v5  ;;  %457 = vmatpush3.bf16.msra.mxu1 %v454_v15  ;;  %v446_v30 = vpack.c.bf16 %v100_v29, %v99_v28  ;;  %v450_v33 = vpack.c.bf16 %v102_v32, %v101_v31  ;;  %v86_v34 = vld [vmem:[#allocation2 + $0x8] sm:$0xff]  ;;  %v203_v38 = vld [vmem:[#allocation8 + $0x40] sm:$0xff]  ;;  %v204_v39 = vld [vmem:[#allocation8 + $0x48] sm:$0xff] }
  0x64   :  { %431 = vmatprep.subr.bf16.mxu0 %v430_v8  ;;  %459 = vmatprep.subr.bf16.mxu1 %v458_v17  ;;  %v201_v35 = vld [vmem:[#allocation8 + $0x30] sm:$0xff]  ;;  %v202_v36 = vld [vmem:[#allocation8 + $0x38] sm:$0xff]  ;;  %v470_v40 = vpack.c.bf16 %v204_v39, %v203_v38  ;;  %v207_v44 = vld [vmem:[#allocation8 + $0x60] sm:$0xff] }
  0x65   :  { %v466_v37 = vpack.c.bf16 %v202_v36, %v201_v35  ;;  %v205_v41 = vld [vmem:[#allocation8 + $0x50] sm:$0xff]  ;;  %v206_v42 = vld [vmem:[#allocation8 + $0x58] sm:$0xff]  ;;  %v208_v45 = vld [vmem:[#allocation8 + $0x68] sm:$0xff] }
  0x66   :  { %v474_v43 = vpack.c.bf16 %v206_v42, %v205_v41  ;;  %v478_v46 = vpack.c.bf16 %v208_v45, %v207_v44  ;;  %v209_v47 = vld [vmem:[#allocation8 + $0x70] sm:$0xff]  ;;  %v210_v48 = vld [vmem:[#allocation8 + $0x78] sm:$0xff]  ;;  %v315_v1 = vld [vmem:[#allocation10] ss:$0 sm:$0xff] }
  0x67   :  { %433 = vmatpush3.bf16.msra.mxu0 %v430_v8  ;;  %461 = vmatpush3.bf16.msra.mxu1 %v458_v17  ;;  %v482_v49 = vpack.c.bf16 %v210_v48, %v209_v47  ;;  %v314_v50 = vld [vmem:[#allocation7] ss:$0 sm:$0xff] }
  0x68   :  { %435 = vmatprep.subr.bf16.mxu0 %v434_v20  ;;  %463 = vmatprep.subr.bf16.mxu1 %v462_v23 }
  0x6b   :  { %437 = vmatpush3.bf16.msra.mxu0 %v434_v20  ;;  %465 = vmatpush3.bf16.msra.mxu1 %v462_v23 }
  0x6c   :  { %439 = vmatprep.subr.bf16.mxu0 %v438_v24  ;;  %467 = vmatprep.subr.bf16.mxu1 %v466_v37 }
  0x6f   :  { %441 = vmatpush3.bf16.msra.mxu0 %v438_v24  ;;  %469 = vmatpush3.bf16.msra.mxu1 %v466_v37 }
  0x70   :  { %443 = vmatprep.subr.bf16.mxu0 %v442_v27  ;;  %471 = vmatprep.subr.bf16.mxu1 %v470_v40 }
  0x73   :  { %445 = vmatpush3.bf16.msra.mxu0 %v442_v27  ;;  %473 = vmatpush3.bf16.msra.mxu1 %v470_v40 }
  0x74   :  { %447 = vmatprep.subr.bf16.mxu0 %v446_v30  ;;  %475 = vmatprep.subr.bf16.mxu1 %v474_v43 }
  0x77   :  { %449 = vmatpush3.bf16.msra.mxu0 %v446_v30  ;;  %477 = vmatpush3.bf16.msra.mxu1 %v474_v43 }
  0x78   :  { %451 = vmatprep.subr.bf16.mxu0 %v450_v33  ;;  %479 = vmatprep.subr.bf16.mxu1 %v478_v46 }
  0x7b   :  { %453 = vmatpush3.bf16.msra.mxu0 %v450_v33  ;;  %481 = vmatpush3.bf16.msra.mxu1 %v478_v46 }
  0x7c   :  { %483 = vmatprep.subr.bf16.mxu1 %v482_v49 }
  0x7e   :  { %385 = vmatmul.mubr.f32.vlgmr.msra.gmra.mrb[0].mxu0 %v86_v34 }
  0x7f   :  { %485 = vmatpush3.bf16.msra.mxu1 %v482_v49 }
 0x151   :  { %v386_v51 = vpop.f32.mrb[0].mxu0 }
 0x152   :  { %v182_v52 = vadd.f32 %v386_v51, %v314_v50  ;;  %v176_v53 = vpop.f32.mrb[1].mxu0 }
 0x153   :  { %v177_v54 = vadd.f32 %v314_v50, %v176_v53 }
 0x154   :  { %v188_v55 = vmul.f32 0.70710677, %v182_v52  ;;  %v186_v62 = vmul.f32 0.5, %v182_v52 }
 0x155   :  { %v187_v56 = vmul.f32 0.70710677, %v177_v54  ;;  %v185_v60 = vmul.f32 0.5, %v177_v54 }
 0x156   :  { %494 = verf.f32 %v188_v55 }
 0x157   :  { %496 = verf.f32 %v187_v56 }
 0x160   :  { %v495_v57 = vpop.eup %494 }
 0x161   :  { %v497_v58 = vpop.eup %496  ;;  %v192_v59 = vadd.f32 1.0, %v495_v57 }
 0x162   :  { %v191_v61 = vadd.f32 1.0, %v497_v58 }
 0x163   :  { %v194_v0 = vmul.f32 %v192_v59, %v186_v62 }
 0x164   :  { %v193_v63 = vmul.f32 %v191_v61, %v185_v60 }
 0x166   :  { %419 = vmatprep.mubr.f32.mxu1 %v193_v63 }
 0x167   :  { %420 = vmatmul.mubr.f32.vlgmr.msra.gmra.mrb[0].mxu1 %v194_v0 }
 0x23a   :  { %v421_v2 = vpop.f32.mrb[0].mxu1 }
 0x23b   :  { %v290_v3 = vadd.f32 %v421_v2, %v315_v1  ;;  %v284_v4 = vpop.f32.mrb[1].mxu1 }
 0x23c   :  { %v285_v5 = vadd.f32 %v315_v1, %v284_v4 }
 0x23d   :  { %294 = vst [vmem:[#allocation11 + $0x8] sm:$0xff] %v290_v3 }
 0x23e   :  { %293 = vst [vmem:[#allocation11] sm:$0xff] %v285_v5 }
 0x23f   :  { %619 = shalt.err (!%p616_p2)
}
 0x240   :  { %s620_s9 = scalar_lea.hbm %s772_s5, 256 }
 0x241   :  { %p621_p3 = scmp.ne.s32.totalorder %s772_s5, %s620_s9  ;;  %p624_p4 = scmp.lt.u32.totalorder %s620_s9, %s772_s5 }
 0x243   :  { %p626_p5 = pnand %p624_p4, %p621_p3 }
 0x245   :  { %629 = shalt.err (!%p626_p5)
}
 0x246   :  { %306 = dma.vmem_to_hbm [thread:$0]  %s301_s3, 256, %s772_s5, [#allocation4], %s640_s30, %s640_s30, %s641_s6  }
 0x247   :  { %636 = dma.done.wait [#allocation4], 256  }
 0x248   :  { %637 = vsyncadd [#allocation4], 4294967040 }
 0x249   :  { %310 = vsyncpa [#allocation3], 1 }
 0x24a   :  { %311 = vsyncpa [#allocation6], 1 }
 0x24b   :  { %312 = vsyncpa [#allocation9], 1 }
 0x24c   :  { %313 = vsyncpa [#allocation4], 1 }

</bundles_post_ra>
